<compile_context>
chip_gen: v5e
topology: v5e:2x2
jax: 0.10.0
libtpu: 0.0.40
codegen_flags: <defaults>
</compile_context>

<pallas_src>
import jax
import jax.numpy as jnp
from jax import lax
from jax.experimental import pallas as pl
from jax.experimental.pallas import tpu as pltpu


def _round_up(x, m):
    return ((x + m - 1) // m) * m


def _cdiv(a, b):
    return -(-a // b)


# ---------------------------------------------------------------------------
# Kernel: one (batch tile, seq tile) per grid step.
# ---------------------------------------------------------------------------
def caesar_kernel(chars_ref, shift_ref, w1c_ref, w2_ref, b2_ref, out_ref):
    """chars_ref: (Bt, TILE_S, 1)    int32    -- char indices for this tile
       shift_ref: (Bt, 1, H_PAD)     float32  -- hoisted shift_emb @ W1s + b1 per row
       w1c_ref:   (V_PAD, H_PAD)     bfloat16 -- char_embed @ W1c, padded   (resident)
       w2_ref:    (H_PAD, vocab)     bfloat16 -- fc2 weight (true vocab)    (resident)
       b2_ref:    (1, vocab)         float32  -- fc2 bias   (true vocab)    (resident)
       out_ref:   (Bt, TILE_S, vocab) float32 -- unpadded logits block
    """
    bt, tile_s, _ = chars_ref.shape
    v_pad, h_pad = w1c_ref.shape
    vocab = w2_ref.shape[1]
    n_tok = bt * tile_s

    # One-hot gather via compare-with-iota (0/1 is exact in bf16), then flatten the
    # (Bt, TILE_S) token dims for the MXU (lane dim 128-aligned, sublane 8-aligned,
    # so the collapse/split reshapes below are layout-preserving).
    chars = chars_ref[...]                                             # (Bt, TILE_S, 1)
    one_hot = (chars == lax.broadcasted_iota(jnp.int32, (bt, tile_s, v_pad), 2)
               ).astype(w1c_ref.dtype)                                 # (Bt, TILE_S, V_PAD)
    one_hot = one_hot.reshape(n_tok, v_pad)

    # fc1 (char path) on the MXU, then add the hoisted per-row shift path (+b1
    # already folded in) and ReLU.
    h = jnp.dot(one_hot, w1c_ref[...],
                preferred_element_type=jnp.float32)                    # (n_tok, H_PAD)
    h = h.reshape(bt, tile_s, h_pad) + shift_ref[...]                  # per-row broadcast
    h = jnp.maximum(h, 0.0)

    # fc2 -- output width is the true vocab (masked stores beat 4x padded writeback).
    logits = jnp.dot(h.reshape(n_tok, h_pad).astype(w2_ref.dtype), w2_ref[...],
                     preferred_element_type=jnp.float32) + b2_ref[...]  # (n_tok, vocab)
    out_ref[...] = logits.reshape(bt, tile_s, vocab)


# ---------------------------------------------------------------------------
# Parameter folding (done once, offline w.r.t. the forward pass).
# ---------------------------------------------------------------------------
def fold_params(params):
    """Fold embedding tables into fc1; pad only MXU-input dims to 128."""
    vocab, embed_dim = params["char_embed"].shape
    hidden_dim = params["w1"].shape[1]
    v_pad = _round_up(vocab, 128)       # fc1 contraction dim (one-hot width)
    h_pad = _round_up(hidden_dim, 128)  # hidden dim

    w1_char = params["w1"][:embed_dim]        # [E, H]
    w1_shift = params["w1"][embed_dim:]       # [E, H]

    w1c = params["char_embed"] @ w1_char                          # [vocab, H] f32
    w1c_pad = jnp.zeros((v_pad, h_pad), jnp.float32)
    w1c_pad = w1c_pad.at[:vocab, :hidden_dim].set(w1c).astype(jnp.bfloat16)

    shift_fold = params["shift_embed"] @ w1_shift + params["b1"]  # [26, H] f32
    shift_pad = jnp.zeros((26, h_pad), jnp.float32)
    shift_pad = shift_pad.at[:, :hidden_dim].set(shift_fold)

    # fc2: pad only the contraction (hidden) dim; keep the true vocab on the output
    # side so the kernel's logits store is unpadded.
    w2_pad = jnp.zeros((h_pad, vocab), jnp.float32)
    w2_pad = w2_pad.at[:hidden_dim, :].set(params["w2"]).astype(jnp.bfloat16)

    b2 = params["b2"].astype(jnp.float32)[None, :]                # [1, vocab]

    return {"w1c": w1c_pad, "shift_fold": shift_pad, "w2": w2_pad, "b2": b2,
            "vocab": vocab}


# ---------------------------------------------------------------------------
# Forward wrapper.
# ---------------------------------------------------------------------------
def caesar_encrypt_forward(x_chars, x_shifts, kparams, token_budget=2048):
    """x_chars: [B, S] int, x_shifts: [B] int -> logits [B, S, vocab] f32."""
    B, S = x_chars.shape
    vocab = kparams["vocab"]
    v_pad, h_pad = kparams["w1c"].shape

    # --- adaptive seq tiling: keep S_pad/S ~ 1 and ~token_budget tokens per step ---
    s_aligned = _round_up(S, 8)
    n_s_tiles = _cdiv(s_aligned, token_budget)
    tile_s = _round_up(_cdiv(s_aligned, n_s_tiles), 8)
    s_pad = tile_s * n_s_tiles

    # --- batch-row packing for short sequences (Bt rows per grid step) ---
    bt = max(1, min(B, token_budget // tile_s))
    while B % bt:
        bt -= 1

    chars = x_chars.astype(jnp.int32)
    if s_pad != S:
        chars = jnp.zeros((B, s_pad), jnp.int32).at[:, :S].set(chars)
    chars = chars[:, :, None]                                      # [B, S_pad, 1]
    # NOTE: the (Bt, tile_s, 1) int32 block lane-pads to 128 in VMEM (~512 B/token);
    # acceptable at this token budget. TODO(synk): feed indices via SMEM scalar
    # prefetch if this VMEM cost ever matters.

    # Hoisted shift path: one row per batch element (shift_emb @ W1s + b1), padded H.
    shift_rows = kparams["shift_fold"][x_shifts.astype(jnp.int32)]  # [B, H_pad] f32
    shift_rows = shift_rows[:, None, :]                             # [B, 1, H_pad]

    grid = (B // bt, s_pad // tile_s)

    n_tok = B * s_pad
    cost = pl.CostEstimate(
        flops=2 * n_tok * v_pad * h_pad + 2 * n_tok * h_pad * vocab,
        transcendentals=0,
        bytes_accessed=(4 * n_tok                                   # indices
                        + 4 * B * h_pad                             # shift rows
                        + 2 * (v_pad * h_pad + h_pad * vocab)       # bf16 weights
                        + 4 * vocab                                 # b2
                        + 4 * n_tok * vocab))                       # unpadded logits out

    out = pl.pallas_call(
        caesar_kernel,
        out_shape=jax.ShapeDtypeStruct((B, s_pad, vocab), jnp.float32),
        grid_spec=pltpu.PrefetchScalarGridSpec(
            num_scalar_prefetch=0,
            grid=grid,
            in_specs=[
                pl.BlockSpec((bt, tile_s, 1), lambda b, s: (b, s, 0)),   # chars
                pl.BlockSpec((bt, 1, h_pad), lambda b, s: (b, 0, 0)),    # shift rows
                pl.BlockSpec((v_pad, h_pad), lambda b, s: (0, 0)),       # W1c' (resident)
                pl.BlockSpec((h_pad, vocab), lambda b, s: (0, 0)),       # W2   (resident)
                pl.BlockSpec((1, vocab), lambda b, s: (0, 0)),           # b2   (resident)
            ],
            out_specs=pl.BlockSpec((bt, tile_s, vocab), lambda b, s: (b, s, 0)),
        ),
        compiler_params=pltpu.CompilerParams(
            dimension_semantics=("parallel", "parallel"),
            vmem_limit_bytes=32 * 1024 * 1024,
        ),
        cost_estimate=cost,
    )(chars, shift_rows, kparams["w1c"], kparams["w2"], kparams["b2"])

    # Only slice when seq padding was actually added (avoids an XLA copy round trip
    # of the dominant output stream in the common divisible case).
    return out if s_pad == S else out[:, :S]


# ---------------------------------------------------------------------------
# Raw parameter init (mirrors nn.Embedding / nn.Linear shapes) + reference.
# ---------------------------------------------------------------------------
def init_params(key, vocab_size, embed_dim, hidden_dim):
    ks = jax.random.split(key, 6)
    char_embed = jax.random.normal(ks[0], (vocab_size, embed_dim), jnp.float32)
    shift_embed = jax.random.normal(ks[1], (26, embed_dim), jnp.float32)

    fan_in1 = embed_dim * 2
    lim1 = 1.0 / jnp.sqrt(fan_in1)
    w1 = jax.random.uniform(ks[2], (fan_in1, hidden_dim), jnp.float32, -lim1, lim1)
    b1 = jax.random.uniform(ks[3], (hidden_dim,), jnp.float32, -lim1, lim1)

    lim2 = 1.0 / jnp.sqrt(hidden_dim)
    w2 = jax.random.uniform(ks[4], (hidden_dim, vocab_size), jnp.float32, -lim2, lim2)
    b2 = jax.random.uniform(ks[5], (vocab_size,), jnp.float32, -lim2, lim2)

    return {"char_embed": char_embed, "shift_embed": shift_embed,
            "w1": w1, "b1": b1, "w2": w2, "b2": b2}


def reference_forward(x_chars, x_shifts, params):
    """Pure-JAX f32 reference replicating the PyTorch forward exactly."""
    char_emb = params["char_embed"][x_chars]                       # [B, S, E]
    shift_emb = params["shift_embed"][x_shifts]                    # [B, E]
    shift_emb = jnp.broadcast_to(shift_emb[:, None, :], char_emb.shape)
    combined = jnp.concatenate([char_emb, shift_emb], axis=-1)     # [B, S, 2E]
    h = jnp.maximum(combined @ params["w1"] + params["b1"], 0.0)
    return h @ params["w2"] + params["b2"]


if __name__ == "__main__":
    vocab_size, embed_dim, hidden_dim = 32, 16, 32
    batch, seq_len = 2, 8

    key = jax.random.PRNGKey(0)
    kp, kc, ks = jax.random.split(key, 3)
    params = init_params(kp, vocab_size, embed_dim, hidden_dim)
    kparams = fold_params(params)

    x_chars = jax.random.randint(kc, (batch, seq_len), 0, vocab_size, jnp.int32)
    x_shifts = jax.random.randint(ks, (batch,), 0, 26, jnp.int32)

    logits = caesar_encrypt_forward(x_chars, x_shifts, kparams)
    jax.block_until_ready(logits)

    ref = reference_forward(x_chars, x_shifts, params)
    assert logits.shape == (batch, seq_len, vocab_size)
    # bf16 weights + folded-table reordering => slightly looser tolerance than f32.
    assert jnp.allclose(logits, ref, atol=5e-2, rtol=5e-2), "mismatch vs reference"

    print("KERNEL_OK")
</pallas_src>

<mosaic_0001>
module attributes {stable_mosaic.version = 11 : i64} {
  func.func @caesar_kernel(%arg0: i32, %arg1: i32, %arg2: memref<2x8x1xi32, #tpu.memory_space<vmem>>, %arg3: memref<2x1x128xf32, #tpu.memory_space<vmem>>, %arg4: memref<128x128xbf16, #tpu.memory_space<vmem>>, %arg5: memref<128x32xbf16, #tpu.memory_space<vmem>>, %arg6: memref<1x32xf32, #tpu.memory_space<vmem>>, %arg7: memref<2x8x32xf32, #tpu.memory_space<vmem>>) attributes {dimension_semantics = [#tpu.dimension_semantics<parallel>, #tpu.dimension_semantics<parallel>], iteration_bounds = array<i64: 1, 1>, scalar_prefetch = 0 : i64, scratch_operands = 0 : i64, tpu.core_type = #tpu.core_type<tc>, window_params = [{transform_indices = @transform_0, window_bounds = array<i64: 2, 8, 1>}, {transform_indices = @transform_1, window_bounds = array<i64: 2, 1, 128>}, {pipeline_mode = #tpu.pipeline_mode<synchronous>, transform_indices = @transform_2, window_bounds = array<i64: 128, 128>}, {pipeline_mode = #tpu.pipeline_mode<synchronous>, transform_indices = @transform_3, window_bounds = array<i64: 128, 32>}, {pipeline_mode = #tpu.pipeline_mode<synchronous>, transform_indices = @transform_4, window_bounds = array<i64: 1, 32>}, {transform_indices = @transform_5, window_bounds = array<i64: 2, 8, 32>}]} {
    %c0 = arith.constant 0 : index
    %c0_0 = arith.constant 0 : index
    %c0_1 = arith.constant 0 : index
    %0 = vector.load %arg2[%c0, %c0_0, %c0_1] : memref<2x8x1xi32, #tpu.memory_space<vmem>>, vector<2x8x1xi32>
    %1 = tpu.iota {dimensions = array<i32: 2>} : vector<2x8x128xi32>
    %2 = vector.broadcast %0 : vector<2x8x1xi32> to vector<2x8x128xi32>
    %3 = arith.cmpi eq, %2, %1 : vector<2x8x128xi32>
    %4 = arith.extui %3 : vector<2x8x128xi1> to vector<2x8x128xi32>
    %5 = arith.sitofp %4 : vector<2x8x128xi32> to vector<2x8x128xf32>
    %6 = arith.truncf %5 : vector<2x8x128xf32> to vector<2x8x128xbf16>
    %7 = vector.shape_cast %6 : vector<2x8x128xbf16> to vector<16x128xbf16>
    %c0_2 = arith.constant 0 : index
    %c0_3 = arith.constant 0 : index
    %8 = vector.load %arg4[%c0_2, %c0_3] : memref<128x128xbf16, #tpu.memory_space<vmem>>, vector<128x128xbf16>
    %cst = arith.constant dense<0.000000e+00> : vector<16x128xf32>
    %9 = tpu.matmul %7, %8, %cst {dimension_numbers = #tpu.dot_dimension_numbers<[1], [0], [0], [1], [0, 0, 1, 1], [], []>} : vector<16x128xbf16>, vector<128x128xbf16>, vector<16x128xf32> -> vector<16x128xf32>
    %10 = vector.shape_cast %9 : vector<16x128xf32> to vector<2x8x128xf32>
    %c0_4 = arith.constant 0 : index
    %c0_5 = arith.constant 0 : index
    %c0_6 = arith.constant 0 : index
    %11 = vector.load %arg3[%c0_4, %c0_5, %c0_6] : memref<2x1x128xf32, #tpu.memory_space<vmem>>, vector<2x1x128xf32>
    %12 = vector.broadcast %11 : vector<2x1x128xf32> to vector<2x8x128xf32>
    %13 = arith.addf %10, %12 : vector<2x8x128xf32>
    %cst_7 = arith.constant 0.000000e+00 : f32
    %14 = vector.broadcast %cst_7 : f32 to vector<2x8x128xf32>
    %15 = arith.maximumf %13, %14 : vector<2x8x128xf32>
    %16 = vector.shape_cast %15 : vector<2x8x128xf32> to vector<16x128xf32>
    %17 = arith.truncf %16 : vector<16x128xf32> to vector<16x128xbf16>
    %c0_8 = arith.constant 0 : index
    %c0_9 = arith.constant 0 : index
    %18 = vector.load %arg5[%c0_8, %c0_9] : memref<128x32xbf16, #tpu.memory_space<vmem>>, vector<128x32xbf16>
    %cst_10 = arith.constant dense<0.000000e+00> : vector<16x32xf32>
    %19 = tpu.matmul %17, %18, %cst_10 {dimension_numbers = #tpu.dot_dimension_numbers<[1], [0], [0], [1], [0, 0, 1, 1], [], []>} : vector<16x128xbf16>, vector<128x32xbf16>, vector<16x32xf32> -> vector<16x32xf32>
    %c0_11 = arith.constant 0 : index
    %c0_12 = arith.constant 0 : index
    %20 = vector.load %arg6[%c0_11, %c0_12] : memref<1x32xf32, #tpu.memory_space<vmem>>, vector<1x32xf32>
    %21 = vector.broadcast %20 : vector<1x32xf32> to vector<16x32xf32>
    %22 = arith.addf %19, %21 : vector<16x32xf32>
    %23 = vector.shape_cast %22 : vector<16x32xf32> to vector<2x8x32xf32>
    %c0_13 = arith.constant 0 : index
    %c0_14 = arith.constant 0 : index
    %c0_15 = arith.constant 0 : index
    %24 = vector.load %arg7[%c0_13, %c0_14, %c0_15] : memref<2x8x32xf32, #tpu.memory_space<vmem>>, vector<2x8x32xf32>
    tpu.vector_store %arg7[%c0_13, %c0_14, %c0_15], %23 {strides = array<i32>} : memref<2x8x32xf32, #tpu.memory_space<vmem>>, vector<2x8x32xf32>,
    return
  }
  func.func @transform_0(%arg0: i32, %arg1: i32) -> (i32, i32, i32) {
    %c0_i32 = arith.constant 0 : i32
    %c0_i32_0 = arith.constant 0 : i32
    return %arg0, %arg1, %c0_i32 : i32, i32, i32
  }
  func.func @transform_1(%arg0: i32, %arg1: i32) -> (i32, i32, i32) {
    %c0_i32 = arith.constant 0 : i32
    %c0_i32_0 = arith.constant 0 : i32
    %c0_i32_1 = arith.constant 0 : i32
    return %arg0, %c0_i32, %c0_i32_0 : i32, i32, i32
  }
  func.func @transform_2(%arg0: i32, %arg1: i32) -> (i32, i32) {
    %c0_i32 = arith.constant 0 : i32
    %c0_i32_0 = arith.constant 0 : i32
    %c0_i32_1 = arith.constant 0 : i32
    return %c0_i32, %c0_i32_0 : i32, i32
  }
  func.func @transform_3(%arg0: i32, %arg1: i32) -> (i32, i32) {
    %c0_i32 = arith.constant 0 : i32
    %c0_i32_0 = arith.constant 0 : i32
    %c0_i32_1 = arith.constant 0 : i32
    return %c0_i32, %c0_i32_0 : i32, i32
  }
  func.func @transform_4(%arg0: i32, %arg1: i32) -> (i32, i32) {
    %c0_i32 = arith.constant 0 : i32
    %c0_i32_0 = arith.constant 0 : i32
    %c0_i32_1 = arith.constant 0 : i32
    return %c0_i32, %c0_i32_0 : i32, i32
  }
  func.func @transform_5(%arg0: i32, %arg1: i32) -> (i32, i32, i32) {
    %c0_i32 = arith.constant 0 : i32
    %c0_i32_0 = arith.constant 0 : i32
    return %arg0, %arg1, %c0_i32 : i32, i32, i32
  }
}

</mosaic_0001>

<bundles_post_ra>
// kernel: tpu_custom_call.1
= control target key start
LH: loop header
LB: loop body
LE: loop exit
PB: predicated region body
PF: predicated region fallthrough
CT: control target
= control target key end

     0   :  { %v356_v2 = vmov 0   ;;  %s457_s0 = inlined_call_operand.vmem [shape: s32[2,8,1], index: 0, kind: input, shape index: {}]   ;;  %s458_s1 = inlined_call_operand.vmem [shape: f32[2,1,128], index: 1, kind: input, shape index: {}]   ;;  %s459_s2 = inlined_call_operand.vmem [shape: bf16[128,128], index: 2, kind: input, shape index: {}]   ;;  %s460_s3 = inlined_call_operand.vmem [shape: bf16[128,32], index: 3, kind: input, shape index: {}]   ;;  %s461_s4 = inlined_call_operand.vmem [shape: f32[1,32], index: 4, kind: input, shape index: {}]   ;;  %s462_s5 = inlined_call_operand.hbm [shape: f32[2,8,32], index: 5, kind: output, shape index: {}]  }
   0x1   :  { %v21_v0 = vld [vmem:[%s457_s0] sm:$0xff]  ;;  %v312_v1 = vld [vmem:[%s459_s2 + $0x38] sm:$0xff]  ;;  %326 = vset.pattern.permute.xlu0 %v356_v2  ;;  %v311_v3 = vld [vmem:[%s459_s2 + $0x30] sm:$0xff] }
   0x2   :  { %26 = vperm.xlu0 %326, %v21_v0   ;;  %109 = vmatpush.bf16.msra.mxu0 %v312_v1 }
   0x3   :  { %10 = vsyncpa [#allocation3], 0  ;;  %v310_v4 = vld [vmem:[%s459_s2 + $0x28] sm:$0xff]  ;;  %v309_v6 = vld [vmem:[%s459_s2 + $0x20] sm:$0xff]  ;;  %v23_v14 = vlaneseq  ;;  %v357_v18 = vmov 0.0   ;;  %vm218_vm2 = vcmask 261120  }
   0x4   :  { %v22_v5 = vld [vmem:[%s457_s0 + $0x8] sm:$0xff]  ;;  %v308_v7 = vld [vmem:[%s459_s2 + $0x18] sm:$0xff]  ;;  %v307_v8 = vld [vmem:[%s459_s2 + $0x10] sm:$0xff]  ;;  %s359_s0 = smov 128   ;;  %s360_s11 = smov 8  }
   0x5   :  { %v306_v9 = vld [vmem:[%s459_s2 + $0x8] sm:$0xff]  ;;  %v305_v10 = vld [vmem:[%s459_s2] sm:$0xff]  ;;  %v320_v11 = vld [vmem:[%s460_s3 + $0x38] sm:$0xff]  ;;  %v24_v16 = vand.u32 127, %v23_v14 }
   0x6   :  { %110 = vmatpush.bf16.msra.mxu0 %v311_v3  ;;  %204 = vmatpush.bf16.msra.mxu1 %v320_v11  ;;  %v319_v12 = vld [vmem:[%s460_s3 + $0x30] sm:$0xff]  ;;  %v318_v13 = vld [vmem:[%s460_s3 + $0x28] sm:$0xff]  ;;  %v317_v15 = vld [vmem:[%s460_s3 + $0x20] sm:$0xff] }
   0x7   :  { %v316_v27 = vld [vmem:[%s460_s3 + $0x18] sm:$0xff]  ;;  %v315_v28 = vld [vmem:[%s460_s3 + $0x10] sm:$0xff]  ;;  %v314_v29 = vld [vmem:[%s460_s3 + $0x8] sm:$0xff] }
   0x8   :  { %v313_v30 = vld [vmem:[%s460_s3] sm:$0xff]  ;;  %s358_s3 = smov [#allocation2]  }
   0x9   :  { %v327_v32 = vld [vmem:[%s458_s1] ss:$0 sm:$0xff]  ;;  %v328_v33 = vld [vmem:[%s458_s1 + $0x1] ss:$0 sm:$0xff]  ;;  %s225_s8 = sshll.u32 %s358_s3, 4  ;;  %s227_s1 = sshll.u32 %s462_s5, 4  ;;  %s226_s8 = int_to_ptr.vmem [resolvable:$true] %s225_s8  ;;  %s228_s1 = int_to_ptr.hbm [resolvable:$true] %s227_s1 }
   0xa   :  { %29 = vperm.xlu0 %326, %v22_v5   ;;  %111 = vmatpush.bf16.msra.mxu0 %v310_v4  ;;  %v329_v40 = vld [vmem:[%s461_s4] ss:$0 sm:$0xff] }
   0xb   :  { %205 = vmatpush.bf16.msra.mxu1 %v319_v12 }
   0xe   :  { %112 = vmatpush.bf16.msra.mxu0 %v309_v6 }
   0xf   :  { %206 = vmatpush.bf16.msra.mxu1 %v318_v13 }
  0x12   :  { %113 = vmatpush.bf16.msra.mxu0 %v308_v7 }
  0x13   :  { %207 = vmatpush.bf16.msra.mxu1 %v317_v15 }
  0x16   :  { %114 = vmatpush.bf16.msra.mxu0 %v307_v8 }
  0x17   :  { %208 = vmatpush.bf16.msra.mxu1 %v316_v27 }
  0x1a   :  { %115 = vmatpush.bf16.msra.mxu0 %v306_v9 }
  0x1b   :  { %209 = vmatpush.bf16.msra.mxu1 %v315_v28 }
  0x1e   :  { %116 = vmatpush.bf16.msra.mxu0 %v305_v10 }
  0x1f   :  { %210 = vmatpush.bf16.msra.mxu1 %v314_v29 }
  0x23   :  { %211 = vmatpush.bf16.msra.mxu1 %v313_v30 }
  0x74   :  { %v27_v17 = vpop.permute.xlu0 %26 }
  0x75   :  { %vm31_vm0 = vcmp.eq.s32.totalorder %v27_v17, %v24_v16 }
  0x76   :  { %v239_v19 = vsel %vm31_vm0, 1.0, %v357_v18 }
  0x77   :  { %v37_v21 = vpack.c.bf16 %v239_v19, %v239_v19 }
  0x79   :  { %v57_v24 = vunpack.c.l.b16 %v37_v21 }
  0x7c   :  { %v30_v20 = vpop.permute.xlu0 %29 }
  0x7d   :  { %vm32_vm1 = vcmp.eq.s32.totalorder %v30_v20, %v24_v16 }
  0x7e   :  { %v240_v22 = vsel %vm32_vm1, 1.0, %v357_v18 }
  0x7f   :  { %v38_v23 = vpack.c.bf16 %v240_v22, %v240_v22 }
  0x81   :  { %v58_v25 = vunpack.c.l.b16 %v38_v23 }
  0x83   :  { %v59_v26 = vpack.c.b16 %v58_v25, %v57_v24 }
  0x85   :  { %117 = vmatmul.bf16.vlgmr.msra.gmra.mxu0 %v59_v26 }
 0x102   :  { %v118_v31 = vpop.f32.mrf.mxu0 }
 0x103   :  { %v131_v34 = vadd.f32 %v327_v32, %v118_v31 }
 0x105   :  { %v133_v37 = vmax.f32 %v131_v34, 0.0 }
 0x10a   :  { %v120_v35 = vpop.f32.mrf.mxu0 }
 0x10b   :  { %v132_v36 = vadd.f32 %v328_v33, %v120_v35 }
 0x10d   :  { %v134_v38 = vmax.f32 %v132_v36, 0.0 }
 0x10f   :  { %v135_v39 = vpack.c.bf16 %v134_v38, %v133_v37 }
 0x111   :  { %212 = vmatmul.bf16.vlgmr.msra.gmra.mxu1 %v135_v39 }
 0x18e   :  { %v213_v41 = vpop.f32.mrf.mxu1 }
 0x18f   :  { %v214_v42 = vadd.f32 %v329_v40, %v213_v41 }
 0x191   :  { %219 = vst.msk [vmem:[#allocation2] sm:$0xff] %vm218_vm2, %v214_v42 }
 0x196   :  { %v215_v43 = vpop.f32.mrf.mxu1 }
 0x197   :  { %v216_v44 = vadd.f32 %v329_v40, %v215_v43 }
 0x199   :  { %220 = vst.msk [vmem:[#allocation2 + $0x8] sm:$0xff] %vm218_vm2, %v216_v44 }
 0x19a   :  { %233 = dma.vmem_to_hbm [thread:$0]  %s226_s8, 256, %s228_s1, [#allocation3], %s359_s0, %s359_s0, %s360_s11  }
 0x19b   :  { %354 = dma.done.wait [#allocation3], 256  }
 0x19c   :  { %355 = vsyncadd [#allocation3], 4294967040 }
 0x19d   :  { %238 = vsyncpa [#allocation3], 1 }

</bundles_post_ra>
